<compile_context>
chip_gen: v7x
topology: tpu7x:2x2x1
jax: 0.10.0
libtpu: 0.0.40
codegen_flags: <defaults>
</compile_context>

<pallas_src>
import jax
import jax.numpy as jnp
from jax.experimental import pallas as pl
from jax.experimental.pallas import tpu as pltpu


def _copy_kernel(x_hbm, o_hbm, sem):
    # Single whole-tensor HBM->HBM DMA.  src and dst are contiguous and of
    # identical shape, so one descriptor covers the entire tensor; no VMEM
    # staging, no TensorCore vector work.
    cp = pltpu.make_async_copy(x_hbm, o_hbm, sem)
    cp.start()
    cp.wait()


def _pallas_reshape_copy(x, out_shape):
    # The unsqueeze/squeeze itself is metadata-only; perform it outside the
    # kernel (zero-cost bitcast) so the kernel is a pure same-shape copy.
    x_view = jnp.reshape(x, out_shape)
    nbytes = x.size * x.dtype.itemsize
    return pl.pallas_call(
        _copy_kernel,
        out_shape=jax.ShapeDtypeStruct(out_shape, x.dtype),
        # Keep both operands in HBM: no VMEM round-trip, no vld/vst work.
        in_specs=[pl.BlockSpec(memory_space=pl.ANY)],
        out_specs=pl.BlockSpec(memory_space=pl.ANY),
        scratch_shapes=[pltpu.SemaphoreType.DMA(())],
        cost_estimate=pl.CostEstimate(
            flops=0, transcendentals=0, bytes_accessed=2 * nbytes),
    )(x_view)


def reshape_data(x, seq_len, is_input=True, use_pallas=False):
    """Pallas/JAX equivalent of ReshapeData.forward."""
    if is_input:
        B, S, H = x.shape
        assert S == seq_len
        out_shape = (B, 1, S, H)
    else:
        B, one, S, H = x.shape
        assert one == 1 and S == seq_len
        out_shape = (B, S, H)

    if not use_pallas:
        # Highest-value path: unsqueeze(1)/squeeze(1) is metadata-only; XLA
        # lowers this reshape to a zero-cost bitcast (no HBM traffic).
        return jnp.reshape(x, out_shape)

    return _pallas_reshape_copy(x, out_shape)


if __name__ == "__main__":
    key = jax.random.PRNGKey(0)
    B, S, H = 2, 8, 32

    x = jax.random.normal(key, (B, S, H), dtype=jnp.float32)
    expected_unsq = x[:, None, :, :]

    # Default zero-cost path: (B, S, H) -> (B, 1, S, H)
    y0 = jax.block_until_ready(reshape_data(x, seq_len=S, is_input=True))
    assert y0.shape == (B, 1, S, H), y0.shape
    assert jnp.array_equal(y0, expected_unsq), "zero-cost unsqueeze mismatch"

    # Pallas single whole-tensor DMA path: (B, S, H) -> (B, 1, S, H)
    y1 = jax.block_until_ready(
        reshape_data(x, seq_len=S, is_input=True, use_pallas=True))
    assert y1.shape == (B, 1, S, H), y1.shape
    assert jnp.array_equal(y1, expected_unsq), "pallas unsqueeze mismatch"

    # Pallas single whole-tensor DMA path: (B, 1, S, H) -> (B, S, H)
    z1 = jax.block_until_ready(
        reshape_data(y1, seq_len=S, is_input=False, use_pallas=True))
    assert z1.shape == (B, S, H), z1.shape
    assert jnp.array_equal(z1, x), "pallas squeeze mismatch"

    # Default zero-cost path: (B, 1, S, H) -> (B, S, H)
    z0 = jax.block_until_ready(reshape_data(y0, seq_len=S, is_input=False))
    assert z0.shape == (B, S, H), z0.shape
    assert jnp.array_equal(z0, x), "zero-cost squeeze mismatch"

    print("KERNEL_OK")
</pallas_src>

<mosaic_0001>
module attributes {stable_mosaic.version = 11 : i64} {
  func.func @_copy_kernel(%arg0: memref<2x1x8x32xf32, #tpu.memory_space<any>>, %arg1: memref<2x1x8x32xf32, #tpu.memory_space<any>>, %arg2: memref<!tpu.dma_semaphore, #tpu.memory_space<semaphore_mem>>) attributes {dimension_semantics = [], scalar_prefetch = 0 : i64, scratch_operands = 1 : i64, tpu.core_type = #tpu.core_type<tc>} {
    tpu.enqueue_dma source(%arg0 : memref<2x1x8x32xf32, #tpu.memory_space<any>>) target(%arg1 : memref<2x1x8x32xf32, #tpu.memory_space<any>>) target_semaphore(%arg2 : memref<!tpu.dma_semaphore, #tpu.memory_space<semaphore_mem>>)
    tpu.wait_dma2 semaphore(%arg2 : memref<!tpu.dma_semaphore, #tpu.memory_space<semaphore_mem>>) src(%arg0 : memref<2x1x8x32xf32, #tpu.memory_space<any>>) dst(%arg1 : memref<2x1x8x32xf32, #tpu.memory_space<any>>)
    return
  }
}

</mosaic_0001>

<bundles_post_ra>
// kernel: tpu_custom_call.1
= control target key start
LH: loop header
LB: loop body
LE: loop exit
PB: predicated region body
PF: predicated region fallthrough
CT: control target
= control target key end

     0   :  { %s36_s6 = smov [#allocation2]   ;;  %s37_s7 = smov [#allocation3]   ;;  %s55_s0 = inlined_call_operand.hbm [shape: f32[2,1,8,32], index: 0, kind: input, shape index: {}]   ;;  %s56_s1 = inlined_call_operand.hbm [shape: f32[2,1,8,32], index: 1, kind: output, shape index: {}]  }
   0x1   :  { %s38_s8 = smov 0  }
   0x2   :  { %18 = dma.general %s55_s0, 256, %s56_s1, %s36_s6, %s37_s7, [#allocation4], %s38_s8, 0  }
   0x3   :  { %34 = dma.done.wait [#allocation2], 256 }
   0x4   :  { %35 = vsyncadd [#allocation2], 4294967040 }
   0x5   :  { %24 = vsyncmov [#allocation2] }
   0x8   :  { %s25_s13 = vpop.sfrf %24 }
   0x9   :  { %p30_p0 = scmp.ne.s32.totalorder %s25_s13, 0 }
   0xb   :  { %29 = shalt.err (%p30_p0)  }

</bundles_post_ra>
